<compile_context>
chip_gen: v7x
topology: tpu7x:2x2x1
jax: 0.10.0
libtpu: 0.0.40
codegen_flags: <defaults>
</compile_context>

<pallas_src>
import jax
import jax.numpy as jnp
from jax import lax
from jax.experimental import pallas as pl
from jax.experimental.pallas import tpu as pltpu

# ---- model hyper-parameters (small, consistent with the nn.Module) ----------
VOCAB_SIZE = 50
EMBED = 32
SEQ_LEN = 8
LABELS = 4
BATCH = 2
DROPOUT_P = 0.5   # TODO(synk): dropout is identity here (inference / eval mode)

KSIZES = (3, 4, 5)                 # conv1 / conv2 / conv3 kernel heights
NF = len(KSIZES)                   # 3 filters
KMAX = max(KSIZES)                 # 5
NWIN = BATCH * SEQ_LEN             # 16 flattened (batch, time) rows
LANES = 128

PV = 64                            # per-tap code stride (>= vocab, power of 2)
KH = 3 * LANES                     # 384 one-hot lanes (>= KMAX*PV); matmul K
KPAD = 8                           # padded tap axis of the code matrix
NFP = 8                            # padded filter axis of score table / linear K


# ---- Pallas kernel -----------------------------------------------------------
def textcnn_kernel(code_ref, tab_ref, wlin_ref, out_ref):
    # ---- fused embedding-gather + convs + conv bias: ONE MXU matmul ---------
    # hcat[r, dt*PV + v] = 1 iff token at (row r, tap dt) == v; code == -1
    # (out-of-sequence tap) matches nothing -> contributes exactly 0.
    code = code_ref[...]                                     # (NWIN, KPAD) int32
    c_iota = lax.broadcasted_iota(jnp.int32, (NWIN, KH), 1)
    hcat = (code[:, 0:1] == c_iota).astype(jnp.float32)
    for dt in range(1, KMAX):
        hcat = hcat + (code[:, dt:dt + 1] == c_iota).astype(jnp.float32)
    # scores[r, k] = b_k + sum_dt emb[tok at r+dt] . w_k[dt]   (cols >= NF are 0)
    scores = jnp.dot(hcat, tab_ref[...], preferred_element_type=jnp.float32)

    # ---- mask invalid (t, k) windows, max-pool over time, ReLU --------------
    s3 = scores.reshape(BATCH, SEQ_LEN, NFP)
    t_io = lax.broadcasted_iota(jnp.int32, (BATCH, SEQ_LEN, NFP), 1)
    k_io = lax.broadcasted_iota(jnp.int32, (BATCH, SEQ_LEN, NFP), 2)
    valid = None
    for k, ks in enumerate(KSIZES):          # per-column limit from KSIZES
        cur = (k_io == k) & (t_io <= SEQ_LEN - ks)
        valid = cur if valid is None else (valid | cur)
    pooled = jnp.max(jnp.where(valid, s3, -1e30), axis=1)    # (BATCH, NFP)
    feats = jnp.maximum(pooled, 0.0)         # ReLU(max) == max(ReLU), monotone

    # ---- dropout: identity (eval mode) ---------------------------------------
    # ---- Linear(3, labels): tiny K=8 matmul, bias via a constant-1 lane -----
    col = lax.broadcasted_iota(jnp.int32, (BATCH, NFP), 1)
    g = jnp.where(col == NF, 1.0, jnp.where(col < NF, feats, 0.0))
    out_ref[...] = jnp.dot(g, wlin_ref[...], preferred_element_type=jnp.float32)


# ---- parameter folding (offline, parameters only) ----------------------------
def build_tables(emb_weight, w1, w2, w3, conv_b, lin_w, lin_b):
    """Fold frozen embedding + conv taps (+bias) into a (KH, NFP) token->score
    table, and pack the Linear weight/bias into an (NFP, LANES) block."""
    tab = jnp.zeros((KH, NFP), jnp.float32)
    for k, w in enumerate((w1, w2, w3)):
        for dt in range(w.shape[0]):
            # elementwise mul + sum keeps this exact f32 (no bf16 matmul pass)
            col = jnp.sum(emb_weight * w[dt][None, :], axis=1)     # (VOCAB,)
            if dt == 0:
                col = col + conv_b[k]        # tap 0 is always in-range -> safe
            tab = tab.at[dt * PV: dt * PV + VOCAB_SIZE, k].set(col)
    wlin = jnp.zeros((NFP, LANES), jnp.float32)
    wlin = wlin.at[0:NF, 0:LABELS].set(lin_w.T)      # rows 0..2: W^T
    wlin = wlin.at[NF, 0:LABELS].set(lin_b)          # row 3: bias (hit by 1-lane)
    return tab, wlin


def encode_tokens(tokens):
    """code[b*S+t, dt] = dt*PV + tokens[b, t+dt] if t+dt < S else -1."""
    tok = jnp.clip(tokens.astype(jnp.int32), 0, VOCAB_SIZE - 1)   # id safety
    cols = []
    for dt in range(KMAX):
        sh = jnp.full((BATCH, SEQ_LEN), -1, jnp.int32)
        sh = sh.at[:, :SEQ_LEN - dt].set(tok[:, dt:] + dt * PV)
        cols.append(sh)
    code = jnp.stack(cols, axis=-1).reshape(NWIN, KMAX)
    return jnp.pad(code, ((0, 0), (0, KPAD - KMAX)), constant_values=-1)


def textcnn_forward(tokens, tab, wlin):
    """tokens: (B, S) int32. Returns (B, labels) f32."""
    code = encode_tokens(tokens)
    out = pl.pallas_call(
        textcnn_kernel,
        out_shape=jax.ShapeDtypeStruct((BATCH, LANES), jnp.float32),
        grid=(1,),                                   # whole problem in one step
        in_specs=[
            pl.BlockSpec((NWIN, KPAD), lambda i: (0, 0)),     # shifted token codes
            pl.BlockSpec((KH, NFP), lambda i: (0, 0)),        # folded score table
            pl.BlockSpec((NFP, LANES), lambda i: (0, 0)),     # linear W|b block
        ],
        out_specs=pl.BlockSpec((BATCH, LANES), lambda i: (0, 0)),
        compiler_params=pltpu.CompilerParams(
            dimension_semantics=("arbitrary",)),
    )(code, tab, wlin)
    return out[:, :LABELS]


# ---- pure-JAX reference (for correctness check) ------------------------------
def ref_forward(tokens, emb_weight, w1, w2, w3, conv_b, lin_w, lin_b):
    x = emb_weight[tokens]                           # (B, S, E)

    def conv_feat(w, b):
        k = w.shape[0]
        L = SEQ_LEN - k + 1
        s = jnp.stack([jnp.sum(x[:, t:t + k, :] * w[None], axis=(1, 2))
                       for t in range(L)], axis=1) + b
        return jnp.max(jax.nn.relu(s), axis=1)       # (B,)

    feats = jnp.stack([conv_feat(w1, conv_b[0]),
                       conv_feat(w2, conv_b[1]),
                       conv_feat(w3, conv_b[2])], axis=1)    # (B, 3)
    return feats @ lin_w.T + lin_b[None, :]


# ---- main --------------------------------------------------------------------
if __name__ == "__main__":
    key = jax.random.PRNGKey(0)
    keys = jax.random.split(key, 8)

    emb_weight = jax.random.normal(keys[0], (VOCAB_SIZE, EMBED), jnp.float32) * 0.1
    w1 = jax.random.normal(keys[1], (3, EMBED), jnp.float32) * 0.1   # conv1 (1,1,3,E) squeezed
    w2 = jax.random.normal(keys[2], (4, EMBED), jnp.float32) * 0.1   # conv2
    w3 = jax.random.normal(keys[3], (5, EMBED), jnp.float32) * 0.1   # conv3
    conv_b = jax.random.normal(keys[4], (3,), jnp.float32) * 0.1     # conv biases
    lin_w = jax.random.normal(keys[5], (LABELS, 3), jnp.float32) * 0.1  # Linear(3, labels).weight
    lin_b = jax.random.normal(keys[6], (LABELS,), jnp.float32) * 0.1    # Linear bias
    tokens = jax.random.randint(keys[7], (BATCH, SEQ_LEN), 0, VOCAB_SIZE)

    tab, wlin = build_tables(emb_weight, w1, w2, w3, conv_b, lin_w, lin_b)

    out = textcnn_forward(tokens, tab, wlin)
    out = jax.block_until_ready(out)

    ref = ref_forward(tokens, emb_weight, w1, w2, w3, conv_b, lin_w, lin_b)
    assert out.shape == (BATCH, LABELS)
    assert jnp.allclose(out, ref, atol=2e-3, rtol=2e-3), (out, ref)

    print("KERNEL_OK")
</pallas_src>

<mosaic_0001>
module attributes {stable_mosaic.version = 11 : i64} {
  func.func @textcnn_kernel(%arg0: i32, %arg1: memref<16x8xi32, #tpu.memory_space<vmem>>, %arg2: memref<384x8xf32, #tpu.memory_space<vmem>>, %arg3: memref<8x128xf32, #tpu.memory_space<vmem>>, %arg4: memref<2x128xf32, #tpu.memory_space<vmem>>) attributes {dimension_semantics = [#tpu.dimension_semantics<arbitrary>], iteration_bounds = array<i64: 1>, scalar_prefetch = 0 : i64, scratch_operands = 0 : i64, tpu.core_type = #tpu.core_type<tc>, window_params = [{pipeline_mode = #tpu.pipeline_mode<synchronous>, transform_indices = @transform_0, window_bounds = array<i64: 16, 8>}, {pipeline_mode = #tpu.pipeline_mode<synchronous>, transform_indices = @transform_1, window_bounds = array<i64: 384, 8>}, {pipeline_mode = #tpu.pipeline_mode<synchronous>, transform_indices = @transform_2, window_bounds = array<i64: 8, 128>}, {pipeline_mode = #tpu.pipeline_mode<synchronous>, transform_indices = @transform_3, window_bounds = array<i64: 2, 128>}]} {
    %c0 = arith.constant 0 : index
    %c0_0 = arith.constant 0 : index
    %0 = vector.load %arg1[%c0, %c0_0] : memref<16x8xi32, #tpu.memory_space<vmem>>, vector<16x8xi32>
    %1 = tpu.iota {dimensions = array<i32: 1>} : vector<16x384xi32>
    %2 = vector.extract_strided_slice %0 {offsets = [0, 0], sizes = [16, 1], strides = [1, 1]} : vector<16x8xi32> to vector<16x1xi32>
    %3 = vector.broadcast %2 : vector<16x1xi32> to vector<16x384xi32>
    %4 = arith.cmpi eq, %3, %1 : vector<16x384xi32>
    %5 = arith.extui %4 : vector<16x384xi1> to vector<16x384xi32>
    %6 = arith.sitofp %5 : vector<16x384xi32> to vector<16x384xf32>
    %7 = vector.extract_strided_slice %0 {offsets = [0, 1], sizes = [16, 1], strides = [1, 1]} : vector<16x8xi32> to vector<16x1xi32>
    %8 = vector.broadcast %7 : vector<16x1xi32> to vector<16x384xi32>
    %9 = arith.cmpi eq, %8, %1 : vector<16x384xi32>
    %10 = arith.extui %9 : vector<16x384xi1> to vector<16x384xi32>
    %11 = arith.sitofp %10 : vector<16x384xi32> to vector<16x384xf32>
    %12 = arith.addf %6, %11 : vector<16x384xf32>
    %13 = vector.extract_strided_slice %0 {offsets = [0, 2], sizes = [16, 1], strides = [1, 1]} : vector<16x8xi32> to vector<16x1xi32>
    %14 = vector.broadcast %13 : vector<16x1xi32> to vector<16x384xi32>
    %15 = arith.cmpi eq, %14, %1 : vector<16x384xi32>
    %16 = arith.extui %15 : vector<16x384xi1> to vector<16x384xi32>
    %17 = arith.sitofp %16 : vector<16x384xi32> to vector<16x384xf32>
    %18 = arith.addf %12, %17 : vector<16x384xf32>
    %19 = vector.extract_strided_slice %0 {offsets = [0, 3], sizes = [16, 1], strides = [1, 1]} : vector<16x8xi32> to vector<16x1xi32>
    %20 = vector.broadcast %19 : vector<16x1xi32> to vector<16x384xi32>
    %21 = arith.cmpi eq, %20, %1 : vector<16x384xi32>
    %22 = arith.extui %21 : vector<16x384xi1> to vector<16x384xi32>
    %23 = arith.sitofp %22 : vector<16x384xi32> to vector<16x384xf32>
    %24 = arith.addf %18, %23 : vector<16x384xf32>
    %25 = vector.extract_strided_slice %0 {offsets = [0, 4], sizes = [16, 1], strides = [1, 1]} : vector<16x8xi32> to vector<16x1xi32>
    %26 = vector.broadcast %25 : vector<16x1xi32> to vector<16x384xi32>
    %27 = arith.cmpi eq, %26, %1 : vector<16x384xi32>
    %28 = arith.extui %27 : vector<16x384xi1> to vector<16x384xi32>
    %29 = arith.sitofp %28 : vector<16x384xi32> to vector<16x384xf32>
    %30 = arith.addf %24, %29 : vector<16x384xf32>
    %c0_1 = arith.constant 0 : index
    %c0_2 = arith.constant 0 : index
    %31 = vector.load %arg2[%c0_1, %c0_2] : memref<384x8xf32, #tpu.memory_space<vmem>>, vector<384x8xf32>
    %cst = arith.constant dense<0.000000e+00> : vector<16x8xf32>
    %32 = tpu.matmul %30, %31, %cst {dimension_numbers = #tpu.dot_dimension_numbers<[1], [0], [0], [1], [0, 0, 1, 1], [], []>} : vector<16x384xf32>, vector<384x8xf32>, vector<16x8xf32> -> vector<16x8xf32>
    %33 = vector.shape_cast %32 : vector<16x8xf32> to vector<2x8x8xf32>
    %34 = tpu.iota {dimensions = array<i32: 1>} : vector<2x8x8xi32>
    %35 = tpu.iota {dimensions = array<i32: 2>} : vector<2x8x8xi32>
    %c0_i32 = arith.constant 0 : i32
    %36 = vector.broadcast %c0_i32 : i32 to vector<2x8x8xi32>
    %37 = arith.cmpi eq, %35, %36 : vector<2x8x8xi32>
    %c5_i32 = arith.constant 5 : i32
    %38 = vector.broadcast %c5_i32 : i32 to vector<2x8x8xi32>
    %39 = arith.cmpi sle, %34, %38 : vector<2x8x8xi32>
    %40 = arith.andi %37, %39 : vector<2x8x8xi1>
    %c1_i32 = arith.constant 1 : i32
    %41 = vector.broadcast %c1_i32 : i32 to vector<2x8x8xi32>
    %42 = arith.cmpi eq, %35, %41 : vector<2x8x8xi32>
    %c4_i32 = arith.constant 4 : i32
    %43 = vector.broadcast %c4_i32 : i32 to vector<2x8x8xi32>
    %44 = arith.cmpi sle, %34, %43 : vector<2x8x8xi32>
    %45 = arith.andi %42, %44 : vector<2x8x8xi1>
    %46 = arith.ori %40, %45 : vector<2x8x8xi1>
    %c2_i32 = arith.constant 2 : i32
    %47 = vector.broadcast %c2_i32 : i32 to vector<2x8x8xi32>
    %48 = arith.cmpi eq, %35, %47 : vector<2x8x8xi32>
    %c3_i32 = arith.constant 3 : i32
    %49 = vector.broadcast %c3_i32 : i32 to vector<2x8x8xi32>
    %50 = arith.cmpi sle, %34, %49 : vector<2x8x8xi32>
    %51 = arith.andi %48, %50 : vector<2x8x8xi1>
    %52 = arith.ori %46, %51 : vector<2x8x8xi1>
    %cst_3 = arith.constant -1.000000e+30 : f32
    %53 = vector.broadcast %cst_3 : f32 to vector<2x8x8xf32>
    %54 = arith.select %52, %33, %53 : vector<2x8x8xi1>, vector<2x8x8xf32>
    %cst_4 = arith.constant dense<0xFF800000> : vector<2x8xf32>
    %55 = vector.multi_reduction <maximumf>, %54, %cst_4 [1] : vector<2x8x8xf32> to vector<2x8xf32>
    %cst_5 = arith.constant 0.000000e+00 : f32
    %56 = vector.broadcast %cst_5 : f32 to vector<2x8xf32>
    %57 = arith.maximumf %55, %56 : vector<2x8xf32>
    %58 = tpu.iota {dimensions = array<i32: 1>} : vector<2x8xi32>
    %c3_i32_6 = arith.constant 3 : i32
    %59 = vector.broadcast %c3_i32_6 : i32 to vector<2x8xi32>
    %60 = arith.cmpi eq, %58, %59 : vector<2x8xi32>
    %c3_i32_7 = arith.constant 3 : i32
    %61 = vector.broadcast %c3_i32_7 : i32 to vector<2x8xi32>
    %62 = arith.cmpi slt, %58, %61 : vector<2x8xi32>
    %cst_8 = arith.constant 0.000000e+00 : f32
    %63 = vector.broadcast %cst_8 : f32 to vector<2x8xf32>
    %64 = arith.select %62, %57, %63 : vector<2x8xi1>, vector<2x8xf32>
    %cst_9 = arith.constant 1.000000e+00 : f32
    %65 = vector.broadcast %cst_9 : f32 to vector<2x8xf32>
    %66 = arith.select %60, %65, %64 : vector<2x8xi1>, vector<2x8xf32>
    %c0_10 = arith.constant 0 : index
    %c0_11 = arith.constant 0 : index
    %67 = vector.load %arg3[%c0_10, %c0_11] : memref<8x128xf32, #tpu.memory_space<vmem>>, vector<8x128xf32>
    %cst_12 = arith.constant dense<0.000000e+00> : vector<2x128xf32>
    %68 = tpu.matmul %66, %67, %cst_12 {dimension_numbers = #tpu.dot_dimension_numbers<[1], [0], [0], [1], [0, 0, 1, 1], [], []>} : vector<2x8xf32>, vector<8x128xf32>, vector<2x128xf32> -> vector<2x128xf32>
    %c0_13 = arith.constant 0 : index
    %c0_14 = arith.constant 0 : index
    %69 = vector.load %arg4[%c0_13, %c0_14] : memref<2x128xf32, #tpu.memory_space<vmem>>, vector<2x128xf32>
    tpu.vector_store %arg4[%c0_13, %c0_14], %68 {strides = array<i32>} : memref<2x128xf32, #tpu.memory_space<vmem>>, vector<2x128xf32>,
    return
  }
  func.func @transform_0(%arg0: i32) -> (i32, i32) {
    %c0_i32 = arith.constant 0 : i32
    %c0_i32_0 = arith.constant 0 : i32
    %c0_i32_1 = arith.constant 0 : i32
    return %c0_i32, %c0_i32_0 : i32, i32
  }
  func.func @transform_1(%arg0: i32) -> (i32, i32) {
    %c0_i32 = arith.constant 0 : i32
    %c0_i32_0 = arith.constant 0 : i32
    %c0_i32_1 = arith.constant 0 : i32
    return %c0_i32, %c0_i32_0 : i32, i32
  }
  func.func @transform_2(%arg0: i32) -> (i32, i32) {
    %c0_i32 = arith.constant 0 : i32
    %c0_i32_0 = arith.constant 0 : i32
    %c0_i32_1 = arith.constant 0 : i32
    return %c0_i32, %c0_i32_0 : i32, i32
  }
  func.func @transform_3(%arg0: i32) -> (i32, i32) {
    %c0_i32 = arith.constant 0 : i32
    %c0_i32_0 = arith.constant 0 : i32
    %c0_i32_1 = arith.constant 0 : i32
    return %c0_i32, %c0_i32_0 : i32, i32
  }
}

</mosaic_0001>

<bundles_post_ra>
// kernel: tpu_custom_call.1
= control target key start
LH: loop header
LB: loop body
LE: loop exit
PB: predicated region body
PF: predicated region fallthrough
CT: control target
= control target key end

     0   :  { %v727_v1 = vmov 2   ;;  %v728_v2 = vmov 0   ;;  %v729_v24 = vmov 1   ;;  %s1018_s0 = inlined_call_operand.vmem [shape: s32[16,8], index: 0, kind: input, shape index: {}]   ;;  %s1019_s1 = inlined_call_operand.vmem [shape: f32[384,8], index: 1, kind: input, shape index: {}]   ;;  %s1020_s2 = inlined_call_operand.vmem [shape: f32[8,128], index: 2, kind: input, shape index: {}]   ;;  %s1021_s3 = inlined_call_operand.hbm [shape: f32[2,128], index: 3, kind: output, shape index: {}]  }
   0x1   :  { %v758_v0 = vld [vmem:[%s1018_s0] sm:$0xff]  ;;  %696 = vset.pattern.permute.xlu1 %v727_v1  ;;  %694 = vset.pattern.permute.xlu0 %v728_v2  ;;  %v182_v4 = vld [vmem:[%s1019_s1 + $0x88] sm:$0xff]  ;;  %v183_v13 = vld [vmem:[%s1019_s1 + $0x90] sm:$0xff] }
   0x2   :  { %v181_v3 = vld [vmem:[%s1019_s1 + $0x80] sm:$0xff]  ;;  %76 = vperm.xlu1 %696, %v758_v0   ;;  %22 = vperm.xlu0 %694, %v758_v0   ;;  %v775_v6 = vld [vmem:[%s1018_s0 + $0x8] sm:$0xff]  ;;  %v184_v14 = vld [vmem:[%s1019_s1 + $0x98] sm:$0xff] }
   0x3   :  { %v165_v5 = vld [vmem:[%s1019_s1] sm:$0xff]  ;;  %v622_v7 = vpack.c.bf16 %v182_v4, %v181_v3  ;;  %v166_v8 = vld [vmem:[%s1019_s1 + $0x8] sm:$0xff]  ;;  %v167_v15 = vld [vmem:[%s1019_s1 + $0x10] sm:$0xff]  ;;  %v626_v16 = vpack.c.bf16 %v184_v14, %v183_v13 }
   0x4   :  { %v197_v9 = vld [vmem:[%s1019_s1 + $0x100] sm:$0xff]  ;;  %v198_v10 = vld [vmem:[%s1019_s1 + $0x108] sm:$0xff]  ;;  %v624_v11 = vpack.c.bf16 %v166_v8, %v165_v5  ;;  %v168_v17 = vld [vmem:[%s1019_s1 + $0x18] sm:$0xff] }
   0x5   :  { %v654_v12 = vpack.c.bf16 %v198_v10, %v197_v9  ;;  %623 = vmatprep.subr.bf16.mxu0 %v622_v7  ;;  %v199_v18 = vld [vmem:[%s1019_s1 + $0x110] sm:$0xff]  ;;  %v200_v19 = vld [vmem:[%s1019_s1 + $0x118] sm:$0xff]  ;;  %v628_v20 = vpack.c.bf16 %v168_v17, %v167_v15  ;;  %v185_v22 = vld [vmem:[%s1019_s1 + $0xa0] sm:$0xff] }
   0x6   :  { %625 = vmatpush3.bf16.msra.mxu0 %v624_v11  ;;  %v658_v21 = vpack.c.bf16 %v200_v19, %v199_v18  ;;  %v186_v23 = vld [vmem:[%s1019_s1 + $0xa8] sm:$0xff]  ;;  %697 = vset.pattern.permute.xlu1 %v728_v2  ;;  %v169_v26 = vld [vmem:[%s1019_s1 + $0x20] sm:$0xff]  ;;  %v187_v30 = vld [vmem:[%s1019_s1 + $0xb0] sm:$0xff] }
   0x7   :  { %655 = vmatprep.subr.bf16.mxu1 %v654_v12  ;;  %695 = vset.pattern.permute.xlu0 %v729_v24  ;;  %v630_v25 = vpack.c.bf16 %v186_v23, %v185_v22  ;;  %v170_v27 = vld [vmem:[%s1019_s1 + $0x28] sm:$0xff]  ;;  %v201_v28 = vld [vmem:[%s1019_s1 + $0x120] sm:$0xff]  ;;  %v188_v31 = vld [vmem:[%s1019_s1 + $0xb8] sm:$0xff] }
   0x8   :  { %25 = vperm.xlu1 %697, %v775_v6   ;;  %46 = vperm.xlu0 %695, %v758_v0   ;;  %v202_v29 = vld [vmem:[%s1019_s1 + $0x128] sm:$0xff] }
   0x9   :  { %627 = vmatprep.subr.bf16.mxu0 %v626_v16  ;;  %657 = vmatpush3.bf16.msra.mxu1 %v654_v12 }
   0xa   :  { %8 = vsyncpa [#allocation3], 0  ;;  %629 = vmatpush3.bf16.msra.mxu0 %v628_v20  ;;  %659 = vmatprep.subr.bf16.mxu1 %v658_v21  ;;  %v632_v32 = vpack.c.bf16 %v170_v27, %v169_v26  ;;  %v662_v33 = vpack.c.bf16 %v202_v29, %v201_v28  ;;  %v634_v34 = vpack.c.bf16 %v188_v31, %v187_v30  ;;  %v171_v35 = vld [vmem:[%s1019_s1 + $0x30] sm:$0xff]  ;;  %v730_v36 = vmov 3   ;;  %v172_v37 = vld [vmem:[%s1019_s1 + $0x38] sm:$0xff] }
   0xb   :  { %631 = vmatprep.subr.bf16.mxu0 %v630_v25  ;;  %v203_v38 = vld [vmem:[%s1019_s1 + $0x130] sm:$0xff]  ;;  %v204_v39 = vld [vmem:[%s1019_s1 + $0x138] sm:$0xff]  ;;  %v189_v40 = vld [vmem:[%s1019_s1 + $0xc0] sm:$0xff]  ;;  %v636_v42 = vpack.c.bf16 %v172_v37, %v171_v35  ;;  %v731_v60 = vmov 4   ;;  %v732_v15 = vmov 0.0   ;;  %v17_v16 = vlaneseq }
   0xc   :  { %698 = vset.pattern.permute.xlu1 %v729_v24  ;;  %699 = vset.pattern.permute.xlu0 %v730_v36  ;;  %v190_v41 = vld [vmem:[%s1019_s1 + $0xc8] sm:$0xff]  ;;  %v666_v43 = vpack.c.bf16 %v204_v39, %v203_v38  ;;  %v173_v45 = vld [vmem:[%s1019_s1 + $0x40] sm:$0xff]  ;;  %v191_v49 = vld [vmem:[%s1019_s1 + $0xd0] sm:$0xff] }
   0xd   :  { %49 = vperm.xlu1 %698, %v775_v6   ;;  %106 = vperm.xlu0 %699, %v758_v0   ;;  %v638_v44 = vpack.c.bf16 %v190_v41, %v189_v40  ;;  %v174_v46 = vld [vmem:[%s1019_s1 + $0x48] sm:$0xff]  ;;  %v205_v47 = vld [vmem:[%s1019_s1 + $0x140] sm:$0xff]  ;;  %v192_v50 = vld [vmem:[%s1019_s1 + $0xd8] sm:$0xff]  ;;  %v923_v17 = vand.u32 127, %v17_v16 }
   0xe   :  { %661 = vmatpush3.bf16.msra.mxu1 %v658_v21  ;;  %633 = vmatpush3.bf16.msra.mxu0 %v632_v32  ;;  %v206_v48 = vld [vmem:[%s1019_s1 + $0x148] sm:$0xff]  ;;  %v640_v51 = vpack.c.bf16 %v174_v46, %v173_v45  ;;  %v642_v53 = vpack.c.bf16 %v192_v50, %v191_v49  ;;  %v175_v54 = vld [vmem:[%s1019_s1 + $0x50] sm:$0xff]  ;;  %v176_v55 = vld [vmem:[%s1019_s1 + $0x58] sm:$0xff] }
   0xf   :  { %663 = vmatprep.subr.bf16.mxu1 %v662_v33  ;;  %635 = vmatprep.subr.bf16.mxu0 %v634_v34  ;;  %v670_v52 = vpack.c.bf16 %v206_v48, %v205_v47  ;;  %v207_v56 = vld [vmem:[%s1019_s1 + $0x150] sm:$0xff]  ;;  %v208_v57 = vld [vmem:[%s1019_s1 + $0x158] sm:$0xff]  ;;  %v193_v58 = vld [vmem:[%s1019_s1 + $0xe0] sm:$0xff]  ;;  %v644_v61 = vpack.c.bf16 %v176_v55, %v175_v54  ;;  %v926_v20 = vadd.s32 128, %v923_v17  ;;  %v929_v21 = vadd.s32 256, %v923_v17 }
  0x10   :  { %v194_v59 = vld [vmem:[%s1019_s1 + $0xe8] sm:$0xff]  ;;  %v177_v62 = vld [vmem:[%s1019_s1 + $0x60] sm:$0xff]  ;;  %v674_v63 = vpack.c.bf16 %v208_v57, %v207_v56  ;;  %v195_v4 = vld [vmem:[%s1019_s1 + $0xf0] sm:$0xff] }
  0x11   :  { %700 = vset.pattern.permute.xlu1 %v727_v1  ;;  %109 = vperm.xlu0 %699, %v775_v6   ;;  %v646_v1 = vpack.c.bf16 %v194_v59, %v193_v58  ;;  %v178_v2 = vld [vmem:[%s1019_s1 + $0x68] sm:$0xff]  ;;  %v209_v3 = vld [vmem:[%s1019_s1 + $0x160] sm:$0xff]  ;;  %v196_v5 = vld [vmem:[%s1019_s1 + $0xf8] sm:$0xff] }
  0x12   :  { %79 = vperm.xlu1 %700, %v775_v6   ;;  %665 = vmatpush3.bf16.msra.mxu1 %v662_v33  ;;  %v648_v7 = vpack.c.bf16 %v178_v2, %v177_v62  ;;  %v650_v9 = vpack.c.bf16 %v196_v5, %v195_v4  ;;  %v179_v10 = vld [vmem:[%s1019_s1 + $0x70] sm:$0xff]  ;;  %v180_v11 = vld [vmem:[%s1019_s1 + $0x78] sm:$0xff] }
  0x13   :  { %637 = vmatpush3.bf16.msra.mxu0 %v636_v42  ;;  %667 = vmatprep.subr.bf16.mxu1 %v666_v43  ;;  %v211_v12 = vld [vmem:[%s1019_s1 + $0x170] sm:$0xff]  ;;  %v652_v13 = vpack.c.bf16 %v180_v11, %v179_v10 }
  0x14   :  { %639 = vmatprep.subr.bf16.mxu0 %v638_v44 }
  0x15   :  { %702 = vset.pattern.permute.xlu0 %v731_v60 }
  0x16   :  { %701 = vset.pattern.permute.xlu1 %v731_v60  ;;  %669 = vmatpush3.bf16.msra.mxu1 %v666_v43 }
  0x17   :  { %136 = vperm.xlu1 %701, %v758_v0   ;;  %641 = vmatpush3.bf16.msra.mxu0 %v640_v51  ;;  %v210_v0 = vld [vmem:[%s1019_s1 + $0x168] sm:$0xff] }
  0x18   :  { %671 = vmatprep.subr.bf16.mxu1 %v670_v52  ;;  %643 = vmatprep.subr.bf16.mxu0 %v642_v53  ;;  %v678_v8 = vpack.c.bf16 %v210_v0, %v209_v3 }
  0x1a   :  { %673 = vmatpush3.bf16.msra.mxu1 %v670_v52 }
  0x1b   :  { %139 = vperm.xlu1 %701, %v775_v6   ;;  %645 = vmatpush3.bf16.msra.mxu0 %v644_v61  ;;  %v212_v6 = vld [vmem:[%s1019_s1 + $0x178] sm:$0xff] }
  0x1c   :  { %675 = vmatprep.subr.bf16.mxu1 %v674_v63  ;;  %647 = vmatprep.subr.bf16.mxu0 %v646_v1  ;;  %v682_v14 = vpack.c.bf16 %v212_v6, %v211_v12 }
  0x1e   :  { %677 = vmatpush3.bf16.msra.mxu1 %v674_v63 }
  0x1f   :  { %649 = vmatpush3.bf16.msra.mxu0 %v648_v7  ;;  %679 = vmatprep.subr.bf16.mxu1 %v678_v8 }
  0x20   :  { %651 = vmatprep.subr.bf16.mxu0 %v650_v9 }
  0x22   :  { %681 = vmatpush3.bf16.msra.mxu1 %v678_v8 }
  0x23   :  { %653 = vmatpush3.bf16.msra.mxu0 %v652_v13  ;;  %683 = vmatprep.subr.bf16.mxu1 %v682_v14 }
  0x26   :  { %685 = vmatpush3.bf16.msra.mxu1 %v682_v14 }
  0x27   :  { %617 = vmatprep.subr.mxu1 %v732_v15 }
  0x81   :  { %v77_v18 = vpop.permute.xlu1 %76  ;;  %v23_v19 = vpop.permute.xlu0 %22 }
  0x82   :  { %vm27_vm0 = vcmp.eq.s32.totalorder %v23_v19, %v923_v17  ;;  %vm81_vm1 = vcmp.eq.s32.totalorder %v77_v18, %v923_v17  ;;  %vm28_vm2 = vcmp.eq.s32.totalorder %v23_v19, %v926_v20  ;;  %vm82_vm3 = vcmp.eq.s32.totalorder %v77_v18, %v926_v20 }
  0x83   :  { %v493_v24 = vsel %vm27_vm0, 1.0, %v732_v15  ;;  %vm83_vm5 = vcmp.eq.s32.totalorder %v77_v18, %v929_v21  ;;  %v505_v25 = vsel %vm81_vm1, 1.0, %v732_v15  ;;  %vm29_vm6 = vcmp.eq.s32.totalorder %v23_v19, %v929_v21 }
  0x84   :  { %v494_v26 = vsel %vm28_vm2, 1.0, %v732_v15  ;;  %v506_v29 = vsel %vm82_vm3, 1.0, %v732_v15  ;;  %v507_v31 = vsel %vm83_vm5, 1.0, %v732_v15  ;;  %v495_v32 = vsel %vm29_vm6, 1.0, %v732_v15 }
  0x87   :  { %v26_v22 = vpop.permute.xlu1 %25  ;;  %v47_v23 = vpop.permute.xlu0 %46 }
  0x88   :  { %vm51_vm4 = vcmp.eq.s32.totalorder %v47_v23, %v923_v17  ;;  %vm52_vm7 = vcmp.eq.s32.totalorder %v47_v23, %v926_v20  ;;  %vm53_vm8 = vcmp.eq.s32.totalorder %v47_v23, %v929_v21  ;;  %vm30_vm9 = vcmp.eq.s32.totalorder %v26_v22, %v923_v17 }
  0x89   :  { %v499_v27 = vsel %vm51_vm4, 1.0, %v732_v15  ;;  %v500_v28 = vsel %vm52_vm7, 1.0, %v732_v15  ;;  %vm31_vm10 = vcmp.eq.s32.totalorder %v26_v22, %v926_v20  ;;  %vm32_vm11 = vcmp.eq.s32.totalorder %v26_v22, %v929_v21 }
  0x8a   :  { %v69_v30 = vadd.f32 %v499_v27, %v493_v24  ;;  %v501_v33 = vsel %vm53_vm8, 1.0, %v732_v15  ;;  %v70_v36 = vadd.f32 %v500_v28, %v494_v26  ;;  %v496_v37 = vsel %vm30_vm9, 1.0, %v732_v15 }
  0x8b   :  { %v497_v38 = vsel %vm31_vm10, 1.0, %v732_v15  ;;  %v498_v40 = vsel %vm32_vm11, 1.0, %v732_v15  ;;  %v71_v41 = vadd.f32 %v501_v33, %v495_v32 }
  0x8c   :  { %v50_v34 = vpop.permute.xlu1 %49  ;;  %v107_v35 = vpop.permute.xlu0 %106  ;;  %v99_v42 = vadd.f32 %v505_v25, %v69_v30  ;;  %v100_v49 = vadd.f32 %v506_v29, %v70_v36 }
  0x8d   :  { %vm54_vm12 = vcmp.eq.s32.totalorder %v50_v34, %v923_v17  ;;  %vm55_vm13 = vcmp.eq.s32.totalorder %v50_v34, %v926_v20  ;;  %vm56_vm14 = vcmp.eq.s32.totalorder %v50_v34, %v929_v21  ;;  %vm111_vm15 = vcmp.eq.s32.totalorder %v107_v35, %v923_v17 }
  0x8e   :  { %v502_v39 = vsel %vm54_vm12, 1.0, %v732_v15  ;;  %vm112_vm0 = vcmp.eq.s32.totalorder %v107_v35, %v926_v20  ;;  %v503_v43 = vsel %vm55_vm13, 1.0, %v732_v15  ;;  %v504_v44 = vsel %vm56_vm14, 1.0, %v732_v15 }
  0x8f   :  { %v72_v45 = vadd.f32 %v502_v39, %v496_v37  ;;  %vm113_vm1 = vcmp.eq.s32.totalorder %v107_v35, %v929_v21  ;;  %v511_v47 = vsel %vm111_vm15, 1.0, %v732_v15  ;;  %v512_v50 = vsel %vm112_vm0, 1.0, %v732_v15 }
  0x90   :  { %v110_v46 = vpop.permute.xlu0 %109  ;;  %v73_v54 = vadd.f32 %v503_v43, %v497_v38  ;;  %v74_v55 = vadd.f32 %v504_v44, %v498_v40  ;;  %v129_v56 = vadd.f32 %v511_v47, %v99_v42  ;;  %v101_v60 = vadd.f32 %v507_v31, %v71_v41 }
  0x91   :  { %v80_v48 = vpop.permute.xlu1 %79  ;;  %vm114_vm2 = vcmp.eq.s32.totalorder %v110_v46, %v923_v17  ;;  %vm115_vm6 = vcmp.eq.s32.totalorder %v110_v46, %v926_v20  ;;  %vm116_vm7 = vcmp.eq.s32.totalorder %v110_v46, %v929_v21  ;;  %v513_v61 = vsel %vm113_vm1, 1.0, %v732_v15 }
  0x92   :  { %vm84_vm3 = vcmp.eq.s32.totalorder %v80_v48, %v923_v17  ;;  %vm85_vm4 = vcmp.eq.s32.totalorder %v80_v48, %v926_v20  ;;  %vm86_vm5 = vcmp.eq.s32.totalorder %v80_v48, %v929_v21  ;;  %v514_v57 = vsel %vm114_vm2, 1.0, %v732_v15 }
  0x93   :  { %v508_v51 = vsel %vm84_vm3, 1.0, %v732_v15  ;;  %v509_v52 = vsel %vm85_vm4, 1.0, %v732_v15  ;;  %v510_v53 = vsel %vm86_vm5, 1.0, %v732_v15  ;;  %v515_v59 = vsel %vm115_vm6, 1.0, %v732_v15 }
  0x94   :  { %v102_v58 = vadd.f32 %v508_v51, %v72_v45  ;;  %v103_v62 = vadd.f32 %v509_v52, %v73_v54  ;;  %v104_v63 = vadd.f32 %v510_v53, %v74_v55  ;;  %v516_v1 = vsel %vm116_vm7, 1.0, %v732_v15 }
  0x95   :  { %v130_v3 = vadd.f32 %v512_v50, %v100_v49  ;;  %v131_v0 = vadd.f32 %v513_v61, %v101_v60  ;;  %vm733_vm14 = vmmov 0   ;;  %vm365_vm15 = vcmp.eq.s32.totalorder %v923_v17, 0 }
  0x96   :  { %v137_v2 = vpop.permute.xlu1 %136  ;;  %v132_v11 = vadd.f32 %v514_v57, %v102_v58  ;;  %v133_v12 = vadd.f32 %v515_v59, %v103_v62  ;;  %v134_v6 = vadd.f32 %v516_v1, %v104_v63  ;;  %vm368_vm1 = vcmp.eq.s32.totalorder %v923_v17, 1 }
  0x97   :  { %vm141_vm8 = vcmp.eq.s32.totalorder %v137_v2, %v923_v17  ;;  %vm142_vm9 = vcmp.eq.s32.totalorder %v137_v2, %v926_v20  ;;  %vm143_vm10 = vcmp.eq.s32.totalorder %v137_v2, %v929_v21  ;;  %vm372_vm5 = vcmp.eq.s32.totalorder %v923_v17, 2 }
  0x98   :  { %v517_v4 = vsel %vm141_vm8, 1.0, %v732_v15  ;;  %v518_v5 = vsel %vm142_vm9, 1.0, %v732_v15  ;;  %v519_v7 = vsel %vm143_vm10, 1.0, %v732_v15  ;;  %vm378_vm10 = vcmask 64512  }
  0x99   :  { %v160_v8 = vadd.f32 %v518_v5, %v130_v3  ;;  %v161_v9 = vadd.f32 %v519_v7, %v131_v0  ;;  %v159_v10 = vadd.f32 %v517_v4, %v129_v56 }
  0x9a   :  { %v140_v13 = vpop.permute.xlu1 %139 }
  0x9b   :  { %vm144_vm11 = vcmp.eq.s32.totalorder %v140_v13, %v923_v17  ;;  %vm145_vm12 = vcmp.eq.s32.totalorder %v140_v13, %v926_v20  ;;  %vm146_vm13 = vcmp.eq.s32.totalorder %v140_v13, %v929_v21  ;;  %277 = vmatprep.mubr.f32.mxu0 %v160_v8  ;;  %614 = vmatprep.mubr.f32.mxu1 %v161_v9  ;;  %v404_v20 = vld [vmem:[%s1020_s2] sm:$0xff]  ;;  %v364_v21 = vshrl.u32 %v17_v16, 7  ;;  %s734_s2 = smov [#allocation2]  }
  0x9c   :  { %v520_v14 = vsel %vm144_vm11, 1.0, %v732_v15  ;;  %v521_v18 = vsel %vm145_vm12, 1.0, %v732_v15  ;;  %v522_v19 = vsel %vm146_vm13, 1.0, %v732_v15  ;;  %278 = vmatmul.mubr.f32.vlgmr.msra.gmra.mrb[0].mxu0 %v159_v10  ;;  %vm399_vm11 = vcmask 1041409   ;;  %s485_s29 = sshll.u32 %s734_s2, 4  ;;  %s486_s29 = int_to_ptr.vmem [resolvable:$true] %s485_s29 }
  0x9d   :  { %v162_v22 = vadd.f32 %v520_v14, %v132_v11  ;;  %v163_v23 = vadd.f32 %v521_v18, %v133_v12  ;;  %v164_v24 = vadd.f32 %v522_v19, %v134_v6  ;;  %vm366_vm0 = vcmp.le.s32.totalorder %v364_v21, 5  ;;  %s703_s0 = scalar_lea.vmem %s486_s29, 32  ;;  %p708_p1 = scmp.lt.s32.totalorder %s486_s29, %s486_s29 }
  0x9e   :  { %vm369_vm2 = vcmp.le.s32.totalorder %v364_v21, 4  ;;  %vm367_vm3 = vmand %vm365_vm15, %vm366_vm0  ;;  %vm373_vm6 = vcmp.le.s32.totalorder %v364_v21, 3  ;;  %vm396_vm12 = vcmp.lt.s32.totalorder %v923_v17, 3  ;;  %vm395_vm13 = vcmp.eq.s32.totalorder %v923_v17, 3  ;;  %p704_p0 = scmp.ne.s32.totalorder %s486_s29, %s703_s0  ;;  %p709_p2 = scmp.lt.s32.totalorder %s703_s0, %s703_s0 }
  0x9f   :  { %282 = vmatprep.mubr.f32.mxu0 %v163_v23  ;;  %615 = vmatmul.mubr.f32.vlgmr.msra.gmra.mrb[0].mxu1 %v164_v24  ;;  %vm370_vm4 = vmand %vm368_vm1, %vm369_vm2 }
  0xa0   :  { %283 = vmatmul.mubr.f32.gmra.mrb[2].mxu0 %v162_v22  ;;  %618 = vmatpush3.msra.mxu1 %v404_v20  ;;  %vm371_vm7 = vmor %vm367_vm3, %vm370_vm4  ;;  %p710_p3 = por %p709_p2, %p708_p1 }
  0xa1   :  { %619 = vmatprep.mubr.msk.f32.mxu1 %vm733_vm14, %v732_v15  ;;  %vm374_vm8 = vmand %vm372_vm5, %vm373_vm6 }
  0xa2   :  { %vm375_vm9 = vmor %vm371_vm7, %vm374_vm8  ;;  %p711_p4 = pnand %p710_p3, %p704_p0 }
 0x16f   :  { %v556_v25 = vpop.f32.mrb[0].mxu0 }
 0x170   :  { %v557_v26 = vpop.f32.mrb[1].mxu0 }
 0x171   :  { %v558_v27 = vadd.f32 %v557_v26, %v556_v25 }
 0x172   :  { %v616_v28 = vpop.f32.mrb[0].mxu1 }
 0x173   :  { %v559_v15 = vpop.f32.mrb[2].mxu0  ;;  %v354_v29 = vpop.f32.mrb[1].mxu1 }
 0x174   :  { %v355_v16 = vadd.f32 %v558_v27, %v354_v29  ;;  %v560_v30 = vpop.f32.mrb[3].mxu0 }
 0x175   :  { %v561_v31 = vadd.f32 %v560_v30, %v559_v15 }
 0x176   :  { %v376_v32 = vsel %vm375_vm9, %v355_v16, -1e+30 }
 0x177   :  { %v379_v33 = vsel %vm378_vm10, %v376_v32, -inf  ;;  %v360_v34 = vadd.f32 %v616_v28, %v561_v31 }
 0x178   :  { %v380_v35 = vrot.slane %v379_v33, 4 }
 0x179   :  { %v377_v36 = vsel %vm375_vm9, %v360_v34, -1e+30 }
 0x17a   :  { %v381_v37 = vmax.f32 %v379_v33, %v380_v35  ;;  %v386_v38 = vsel %vm378_vm10, %v377_v36, -inf }
 0x17b   :  { %v387_v39 = vrot.slane %v386_v38, 4 }
 0x17c   :  { %v382_v40 = vrot.slane %v381_v37, 2 }
 0x17d   :  { %v388_v41 = vmax.f32 %v386_v38, %v387_v39 }
 0x17e   :  { %v383_v42 = vmax.f32 %v381_v37, %v382_v40 }
 0x17f   :  { %v389_v43 = vrot.slane %v388_v41, 2 }
 0x180   :  { %v384_v44 = vrot.slane %v383_v42, 1 }
 0x181   :  { %v390_v45 = vmax.f32 %v388_v41, %v389_v43 }
 0x182   :  { %v385_v46 = vmax.f32 %v383_v42, %v384_v44 }
 0x183   :  { %v391_v47 = vrot.slane %v390_v45, 1 }
 0x184   :  { %v393_v49 = vmax.f32 %v385_v46, 0.0 }
 0x185   :  { %v392_v48 = vmax.f32 %v390_v45, %v391_v47 }
 0x187   :  { %v394_v50 = vmax.f32 %v392_v48, 0.0 }
 0x189   :  { %v400_v51 = vsel %vm399_vm11, %v394_v50, %v393_v49 }
 0x18a   :  { %v402_v52 = vsel %vm396_vm12, %v400_v51, 0.0 }
 0x18b   :  { %v403_v53 = vsel %vm395_vm13, 1.0, %v402_v52 }
 0x18c   :  { %620 = vmatmul.mubr.msk.f32.vlgmr.msra.gmra.mrb[2].mxu1 %vm378_vm10, %v403_v53 }
 0x25f   :  { %v474_v54 = vpop.f32.mrb[2].mxu1 }
 0x260   :  { %478 = vst [vmem:[#allocation2] sm:$0x3] %v474_v54  ;;  %v621_v55 = vpop.f32.mrb[3].mxu1 }
 0x261   :  { %714 = shalt.err (!%p711_p4)
}
 0x262   :  { %s715_s5 = scalar_lea.hbm %s1021_s3, 32 }
 0x263   :  { %p716_p5 = scmp.ne.s32.totalorder %s1021_s3, %s715_s5  ;;  %p719_p6 = scmp.lt.u32.totalorder %s715_s5, %s1021_s3 }
 0x265   :  { %p721_p7 = pnand %p719_p6, %p716_p5 }
 0x267   :  { %724 = shalt.err (!%p721_p7)
}
 0x268   :  { %488 = dma.vmem_to_hbm [thread:$0]  %s486_s29, 32, %s1021_s3, [#allocation3]  }
 0x269   :  { %725 = dma.done.wait [#allocation3], 32  }
 0x26a   :  { %726 = vsyncadd [#allocation3], 4294967264 }
 0x26b   :  { %492 = vsyncpa [#allocation3], 1 }

</bundles_post_ra>
